<compile_context>
chip_gen: v5e
topology: v5e:2x2
jax: 0.10.0
libtpu: 0.0.40
codegen_flags: <defaults>
</compile_context>

<pallas_src>
import jax
import jax.numpy as jnp
import numpy as np
from jax.experimental import pallas as pl
from jax.experimental.pallas import tpu as pltpu


def _bilinear_matrix(in_size: int, out_size: int) -> np.ndarray:
    """Dense (out_size, in_size) 1-D interpolation matrix matching
    nn.Upsample(scale_factor=2, mode='bilinear', align_corners=True)."""
    m = np.zeros((out_size, in_size), dtype=np.float32)
    if out_size == 1 or in_size == 1:
        m[:, 0] = 1.0
        return m
    scale = (in_size - 1) / (out_size - 1)
    for i in range(out_size):
        src = i * scale
        i0 = min(int(np.floor(src)), in_size - 1)
        i1 = min(i0 + 1, in_size - 1)
        w1 = src - i0
        w0 = 1.0 - w1
        m[i, i0] += w0
        m[i, i1] += w1
    return m


def _footprint_bytes(tr: int, ch: int, w: int, wo: int) -> int:
    """Rough per-step VMEM footprint (f32, double-buffered ins/outs +
    intermediates) for a row-block of size tr."""
    return 4 * (2 * tr * ch      # RW block (double buffered)
                + 2 * ch * w     # low-res x block
                + 2 * w * wo     # CmT
                + 2 * tr * wo    # output block
                + tr * w         # intermediate (TR, W)
                + tr * wo)       # result before store


def _pick_row_tile(rows: int, ch: int, w: int, wo: int,
                   budget_bytes: int = 24 * 2**20) -> int:
    """Largest row-block (multiple of 8, divisor of `rows`, or `rows` itself)
    whose footprint fits the VMEM budget.  Keeps v7x (64 MiB VMEM) safe for
    large spatial sizes while collapsing to a single block for small ones."""
    if _footprint_bytes(rows, ch, w, wo) <= budget_bytes:
        return rows
    cands = [d for d in range(8, rows, 8) if rows % d == 0]
    for tr in sorted(cands, reverse=True):
        if _footprint_bytes(tr, ch, w, wo) <= budget_bytes:
            return tr
    return cands[0] if cands else rows


def _up_guide_kernel(rw_ref, x_ref, cmt_ref, o_ref):
    # Fused (1x1 conv  +  row interpolation):  (TR, C*H) @ (C*H, W) -> (TR, W)
    t = jnp.dot(rw_ref[...], x_ref[0], preferred_element_type=jnp.float32)
    # Column interpolation:  (TR, W) @ (W, Wo) -> (TR, Wo)
    o_ref[0] = jnp.dot(t, cmt_ref[...],
                       preferred_element_type=jnp.float32).astype(o_ref.dtype)


def up_guide(x, conv_weight, kernel_size=1, mxu_dtype=jnp.float32):
    """x: (N, C, H, W), conv_weight: (K, C, k, k).  Returns (N, K, 2H, 2W)."""
    # TODO(synk): general odd kernel_size > 1 (padding=k//2) not implemented;
    # the module's default configuration is kernel_size=1.
    assert kernel_size == 1, "only kernel_size=1 (module default) supported"
    N, C, H, W = x.shape
    K = conv_weight.shape[0]
    Ho, Wo = 2 * H, 2 * W

    Rm = jnp.asarray(_bilinear_matrix(H, Ho))            # (Ho, H)
    CmT = jnp.asarray(_bilinear_matrix(W, Wo).T)          # (W, Wo) pre-transposed
    Wc = conv_weight.reshape(K, C).astype(jnp.float32)    # 1x1 conv weight

    # Fuse conv + row-interp: RW[(k,o), (c,h)] = Wc[k,c] * R[o,h]
    RW = jnp.kron(Wc, Rm)                                  # (K*Ho, C*H)
    x2 = x.reshape(N, C * H, W)                            # free row-major view

    rows = K * Ho
    TR = _pick_row_tile(rows, C * H, W, Wo)
    G = rows // TR
    vmem_limit = int(min(64 * 2**20,
                         max(16 * 2**20, 2 * _footprint_bytes(TR, C * H, W, Wo))))

    out2 = pl.pallas_call(
        _up_guide_kernel,
        out_shape=jax.ShapeDtypeStruct((N, rows, Wo), x.dtype),
        grid_spec=pltpu.PrefetchScalarGridSpec(
            num_scalar_prefetch=0,
            grid=(N, G),
            in_specs=[
                pl.BlockSpec((TR, C * H), lambda n, g: (g, 0)),     # RW rows
                pl.BlockSpec((1, C * H, W), lambda n, g: (n, 0, 0)),  # low-res x
                pl.BlockSpec((W, Wo), lambda n, g: (0, 0)),         # CmT
            ],
            out_specs=pl.BlockSpec((1, TR, Wo), lambda n, g: (n, g, 0)),
        ),
        compiler_params=pltpu.CompilerParams(
            dimension_semantics=("parallel", "parallel"),
            vmem_limit_bytes=vmem_limit),
    )(RW.astype(mxu_dtype), x2.astype(mxu_dtype), CmT.astype(mxu_dtype))

    # (N, K*Ho, Wo) -> (N, K, Ho, Wo): free row-major reshape, no transpose.
    return out2.reshape(N, K, Ho, Wo)


def _reference(x, conv_weight):
    """Pure-JAX reference in the ORIGINAL module order (upsample, then conv)."""
    N, C, H, W = x.shape
    K = conv_weight.shape[0]
    Rm = jnp.asarray(_bilinear_matrix(H, 2 * H))
    Cm = jnp.asarray(_bilinear_matrix(W, 2 * W))
    Wc = conv_weight.reshape(K, C).astype(jnp.float32)
    up = jnp.einsum('oh,nchw,pw->ncop', Rm, x.astype(jnp.float32), Cm)
    return jnp.einsum('kc,ncop->nkop', Wc, up).astype(x.dtype)


if __name__ == "__main__":
    key = jax.random.PRNGKey(0)
    kx, kw = jax.random.split(key)

    N, CH, H, W = 2, 3, 16, 16          # module default ch=3, kernel_size=1
    x = jax.random.normal(kx, (N, CH, H, W), dtype=jnp.float32)
    conv_w = jax.random.normal(kw, (CH, CH, 1, 1), dtype=jnp.float32) * 0.1

    out = up_guide(x, conv_w, kernel_size=1)
    out = jax.block_until_ready(out)

    ref = _reference(x, conv_w)
    assert out.shape == (N, CH, 2 * H, 2 * W)
    np.testing.assert_allclose(np.asarray(out), np.asarray(ref),
                               rtol=1e-4, atol=1e-4)
    print("KERNEL_OK")
</pallas_src>

<mosaic_0001>
module attributes {stable_mosaic.version = 11 : i64} {
  func.func @_up_guide_kernel(%arg0: i32, %arg1: i32, %arg2: memref<96x48xf32, #tpu.memory_space<vmem>>, %arg3: memref<1x48x16xf32, #tpu.memory_space<vmem>>, %arg4: memref<16x32xf32, #tpu.memory_space<vmem>>, %arg5: memref<1x96x32xf32, #tpu.memory_space<vmem>>) attributes {dimension_semantics = [#tpu.dimension_semantics<parallel>, #tpu.dimension_semantics<parallel>], iteration_bounds = array<i64: 2, 1>, scalar_prefetch = 0 : i64, scratch_operands = 0 : i64, tpu.core_type = #tpu.core_type<tc>, window_params = [{transform_indices = @transform_0, window_bounds = array<i64: 96, 48>}, {transform_indices = @transform_1, window_bounds = array<i64: 1, 48, 16>}, {pipeline_mode = #tpu.pipeline_mode<synchronous>, transform_indices = @transform_2, window_bounds = array<i64: 16, 32>}, {transform_indices = @transform_3, window_bounds = array<i64: 1, 96, 32>}]} {
    %c0 = arith.constant 0 : index
    %c0_0 = arith.constant 0 : index
    %0 = vector.load %arg2[%c0, %c0_0] : memref<96x48xf32, #tpu.memory_space<vmem>>, vector<96x48xf32>
    %c0_1 = arith.constant 0 : index
    %c0_2 = arith.constant 0 : index
    %c0_3 = arith.constant 0 : index
    %1 = vector.load %arg3[%c0_1, %c0_2, %c0_3] : memref<1x48x16xf32, #tpu.memory_space<vmem>>, vector<1x48x16xf32>
    %2 = vector.shape_cast %1 : vector<1x48x16xf32> to vector<48x16xf32>
    %cst = arith.constant dense<0.000000e+00> : vector<96x16xf32>
    %3 = tpu.matmul %0, %2, %cst {dimension_numbers = #tpu.dot_dimension_numbers<[1], [0], [0], [1], [0, 0, 1, 1], [], []>} : vector<96x48xf32>, vector<48x16xf32>, vector<96x16xf32> -> vector<96x16xf32>
    %c0_4 = arith.constant 0 : index
    %c0_5 = arith.constant 0 : index
    %4 = vector.load %arg4[%c0_4, %c0_5] : memref<16x32xf32, #tpu.memory_space<vmem>>, vector<16x32xf32>
    %cst_6 = arith.constant dense<0.000000e+00> : vector<96x32xf32>
    %5 = tpu.matmul %3, %4, %cst_6 {dimension_numbers = #tpu.dot_dimension_numbers<[1], [0], [0], [1], [0, 0, 1, 1], [], []>} : vector<96x16xf32>, vector<16x32xf32>, vector<96x32xf32> -> vector<96x32xf32>
    %c0_7 = arith.constant 0 : index
    %c0_8 = arith.constant 0 : index
    %c0_9 = arith.constant 0 : index
    %6 = vector.load %arg5[%c0_7, %c0_8, %c0_9] : memref<1x96x32xf32, #tpu.memory_space<vmem>>, vector<1x96x32xf32>
    %7 = vector.shape_cast %6 : vector<1x96x32xf32> to vector<96x32xf32>
    %8 = vector.shape_cast %5 : vector<96x32xf32> to vector<1x96x32xf32>
    tpu.vector_store %arg5[%c0_7, %c0_8, %c0_9], %8 {strides = array<i32>} : memref<1x96x32xf32, #tpu.memory_space<vmem>>, vector<1x96x32xf32>,
    return
  }
  func.func @transform_0(%arg0: i32, %arg1: i32) -> (i32, i32) {
    %c0_i32 = arith.constant 0 : i32
    %c0_i32_0 = arith.constant 0 : i32
    return %arg1, %c0_i32 : i32, i32
  }
  func.func @transform_1(%arg0: i32, %arg1: i32) -> (i32, i32, i32) {
    %c0_i32 = arith.constant 0 : i32
    %c0_i32_0 = arith.constant 0 : i32
    %c0_i32_1 = arith.constant 0 : i32
    return %arg0, %c0_i32, %c0_i32_0 : i32, i32, i32
  }
  func.func @transform_2(%arg0: i32, %arg1: i32) -> (i32, i32) {
    %c0_i32 = arith.constant 0 : i32
    %c0_i32_0 = arith.constant 0 : i32
    %c0_i32_1 = arith.constant 0 : i32
    return %c0_i32, %c0_i32_0 : i32, i32
  }
  func.func @transform_3(%arg0: i32, %arg1: i32) -> (i32, i32, i32) {
    %c0_i32 = arith.constant 0 : i32
    %c0_i32_0 = arith.constant 0 : i32
    return %arg0, %arg1, %c0_i32 : i32, i32, i32
  }
}

</mosaic_0001>

<bundles_post_ra>
// kernel: tpu_custom_call.1
= control target key start
LH: loop header
LB: loop body
LE: loop exit
PB: predicated region body
PF: predicated region fallthrough
CT: control target
= control target key end

     0   :  { %s637_s12 = smov 0   ;;  %s639_s13 = smov 0   ;;  %s752_s0 = inlined_call_operand.vmem [shape: f32[96,48], index: 0, kind: input, shape index: {}]   ;;  %s753_s1 = inlined_call_operand.vmem [shape: f32[2,48,16], index: 1, kind: input, shape index: {}]   ;;  %s754_s2 = inlined_call_operand.vmem [shape: f32[16,32], index: 2, kind: input, shape index: {}]   ;;  %s755_s3 = inlined_call_operand.vmem [shape: f32[2,96,32], index: 3, kind: output, shape index: {}]  }
   0x1   :  { %s641_s14 = smov 0  }
   0x2 LB: > { %s25_s15 = sadd.s32 1, %s611_s13  ;;  %p530_p0 = scmp.ge.s32.totalorder %s615_s14, 1  ;;  %s615_s14 = sphi %s641_s14, %s13_s14   ;;  %s611_s13 = sphi %s639_s13, %s757_s13   ;;  %s607_s12 = sphi %s637_s12, %s756_s12  }
   0x3   : > { %p27_p1 = scmp.ge.s32.totalorder %s25_s15, 2  ;;  %p162_p2 = scmp.lt.s32.totalorder %s615_s14, 3 }
   0x5   : > { %s759_s15 = smov (%p27_p1, %s25_s15), 0  ;;  %p163_p3 = pnand %p530_p0, %p162_p2 }
   0x6   : > { %p201_p4 = scmp.lt.s32.totalorder (!%p163_p3), %s607_s12, 1 }
   0x7   : > { %166 = sbr.rel (%p163_p3) target bundleno = 333 (0x14d), region = 32 }
   0xc   : > { %s761_s12 = smov (!%p201_p4, %s607_s12), 1  ;;  %v216_v6 = vld [vmem:[%s752_s0] sm:$0xff]  ;;  %vm234_vm0 = vcmask 392192   ;;  %v222_v7 = vld [vmem:[%s752_s0 + $0x30] sm:$0xff]  ;;  %v217_v8 = vld [vmem:[%s752_s0 + $0x8] sm:$0xff]  ;;  %vm326_vm1 = vcmask 130048  }
   0xd   : > { %s567_s16 = smul.u32 48, %s761_s12  ;;  %v223_v9 = vld [vmem:[%s752_s0 + $0x38] sm:$0xff]  ;;  %v325_v10 = vld [vmem:[%s754_s2 + $0x8] sm:$0xff]  ;;  %v218_v11 = vld [vmem:[%s752_s0 + $0x10] sm:$0xff]  ;;  %vm416_vm2 = vcmask 261120  }
   0xe   : > { %377 = vmatpush.msra.mxu1 %v325_v10  ;;  %565 = vmatpush.msra.mxu3 %v325_v10  ;;  %v224_v12 = vld [vmem:[%s752_s0 + $0x40] sm:$0xff]  ;;  %v219_v13 = vld [vmem:[%s752_s0 + $0x18] sm:$0xff]  ;;  %v225_v14 = vld [vmem:[%s752_s0 + $0x48] sm:$0xff]  ;;  %s568_s25 = smul.u32 96, %s761_s12 }
   0xf   : > { %s205_s19 = scalar_lea.vmem %s753_s1, %s567_s16  ;;  %v220_v15 = vld [vmem:[%s752_s0 + $0x20] sm:$0xff]  ;;  %v226_v16 = vld [vmem:[%s752_s0 + $0x50] sm:$0xff]  ;;  %v221_v17 = vld [vmem:[%s752_s0 + $0x28] sm:$0xff] }
  0x10   : > { %v233_v0 = vld [vmem:[%s205_s19 + $0x28] sm:$0xff]  ;;  %v232_v1 = vld [vmem:[%s205_s19 + $0x20] sm:$0xff]  ;;  %v231_v2 = vld [vmem:[%s205_s19 + $0x18] sm:$0xff]  ;;  %s214_s28 = scalar_lea.vmem %s755_s3, %s568_s25 }
  0x11   : > { %281 = vmatpush.msra.mxu0 %v233_v0  ;;  %559 = vmatpush.msra.mxu2 %v233_v0  ;;  %v230_v3 = vld [vmem:[%s205_s19 + $0x10] sm:$0xff]  ;;  %v229_v4 = vld [vmem:[%s205_s19 + $0x8] sm:$0xff]  ;;  %v228_v5 = vld [vmem:[%s205_s19] sm:$0xff] }
  0x12   : > { %v227_v18 = vld [vmem:[%s752_s0 + $0x58] sm:$0xff]  ;;  %v324_v19 = vld [vmem:[%s754_s2] sm:$0xff] }
  0x13   : > { %282 = vmatpush.msra.mxu0 %v232_v1  ;;  %560 = vmatpush.msra.mxu2 %v232_v1 }
  0x14   : > { %378 = vmatpush.msra.mxu1 %v324_v19  ;;  %566 = vmatpush.msra.mxu3 %v324_v19 }
  0x15   : > { %283 = vmatpush.msra.mxu0 %v231_v2  ;;  %561 = vmatpush.msra.mxu2 %v231_v2 }
  0x17   : > { %284 = vmatpush.msra.mxu0 %v230_v3  ;;  %562 = vmatpush.msra.mxu2 %v230_v3 }
  0x19   : > { %285 = vmatpush.msra.mxu0 %v229_v4  ;;  %563 = vmatpush.msra.mxu2 %v229_v4 }
  0x1b   : > { %286 = vmatpush.msra.mxu0 %v228_v5  ;;  %564 = vmatpush.msra.mxu2 %v228_v5 }
  0x1c   : > { %533 = vmatmul.msk.f32.vlgmr.msra.gmra.mxu0 %vm234_vm0, %v216_v6  ;;  %539 = vmatmul.msk.f32.vlgmr.msra.gmra.mxu2 %vm234_vm0, %v222_v7 }
  0x24   : > { %534 = vmatmul.msk.f32.gmra.mxu0 %vm234_vm0, %v217_v8  ;;  %540 = vmatmul.msk.f32.gmra.mxu2 %vm234_vm0, %v223_v9 }
  0x2c   : > { %535 = vmatmul.msk.f32.gmra.mxu0 %vm234_vm0, %v218_v11  ;;  %541 = vmatmul.msk.f32.gmra.mxu2 %vm234_vm0, %v224_v12 }
  0x34   : > { %536 = vmatmul.msk.f32.gmra.mxu0 %vm234_vm0, %v219_v13  ;;  %542 = vmatmul.msk.f32.gmra.mxu2 %vm234_vm0, %v225_v14 }
  0x3c   : > { %537 = vmatmul.msk.f32.gmra.mxu0 %vm234_vm0, %v220_v15  ;;  %543 = vmatmul.msk.f32.gmra.mxu2 %vm234_vm0, %v226_v16 }
  0x44   : > { %538 = vmatmul.msk.f32.gmra.mxu0 %vm234_vm0, %v221_v17  ;;  %544 = vmatmul.msk.f32.gmra.mxu2 %vm234_vm0, %v227_v18 }
  0x99   : > { %v288_v20 = vpop.f32.mrf.mxu0 }
  0x9a   : > { %545 = vmatmul.msk.f32.vlgmr.msra.gmra.mxu1 %vm326_vm1, %v288_v20 }
  0x9f   : > { %v306_v21 = vpop.f32.mrf.mxu2 }
  0xa1   : > { %v291_v22 = vpop.f32.mrf.mxu0 }
  0xa2   : > { %546 = vmatmul.msk.f32.gmra.mxu1 %vm326_vm1, %v291_v22 }
  0xa7   : > { %v309_v23 = vpop.f32.mrf.mxu2 }
  0xa8   : > { %552 = vmatmul.msk.f32.vlgmr.msra.gmra.mxu3 %vm326_vm1, %v309_v23 }
  0xa9   : > { %v294_v24 = vpop.f32.mrf.mxu0 }
  0xaa   : > { %547 = vmatmul.msk.f32.gmra.mxu1 %vm326_vm1, %v294_v24 }
  0xaf   : > { %v312_v25 = vpop.f32.mrf.mxu2 }
  0xb0   : > { %553 = vmatmul.msk.f32.gmra.mxu3 %vm326_vm1, %v312_v25 }
  0xb1   : > { %v297_v26 = vpop.f32.mrf.mxu0 }
  0xb2   : > { %548 = vmatmul.msk.f32.gmra.mxu1 %vm326_vm1, %v297_v26 }
  0xb7   : > { %v315_v27 = vpop.f32.mrf.mxu2 }
  0xb8   : > { %554 = vmatmul.msk.f32.gmra.mxu3 %vm326_vm1, %v315_v27 }
  0xb9   : > { %v300_v28 = vpop.f32.mrf.mxu0 }
  0xba   : > { %549 = vmatmul.msk.f32.gmra.mxu1 %vm326_vm1, %v300_v28 }
  0xbf   : > { %v318_v29 = vpop.f32.mrf.mxu2 }
  0xc0   : > { %555 = vmatmul.msk.f32.gmra.mxu3 %vm326_vm1, %v318_v29 }
  0xc1   : > { %v303_v30 = vpop.f32.mrf.mxu0 }
  0xc2   : > { %550 = vmatmul.msk.f32.gmra.mxu1 %vm326_vm1, %v303_v30 }
  0xc7   : > { %v321_v31 = vpop.f32.mrf.mxu2 }
  0xc8   : > { %556 = vmatmul.msk.f32.gmra.mxu3 %vm326_vm1, %v321_v31 }
  0xca   : > { %551 = vmatmul.msk.f32.gmra.mxu1 %vm326_vm1, %v306_v21 }
 0x117   : > { %v380_v32 = vpop.f32.mrf.mxu1 }
 0x118   : > { %417 = vst.msk [vmem:[%s214_s28] sm:$0xff] %vm416_vm2, %v380_v32 }
 0x11f   : > { %v383_v33 = vpop.f32.mrf.mxu1 }
 0x120   : > { %418 = vst.msk [vmem:[%s214_s28 + $0x8] sm:$0xff] %vm416_vm2, %v383_v33 }
 0x127   : > { %v386_v34 = vpop.f32.mrf.mxu1 }
 0x128   : > { %419 = vst.msk [vmem:[%s214_s28 + $0x10] sm:$0xff] %vm416_vm2, %v386_v34 }
 0x12b   : > { %v401_v35 = vpop.f32.mrf.mxu3 }
 0x12c   : > { %424 = vst.msk [vmem:[%s214_s28 + $0x38] sm:$0xff] %vm416_vm2, %v401_v35 }
 0x12f   : > { %v389_v36 = vpop.f32.mrf.mxu1 }
 0x130   : > { %420 = vst.msk [vmem:[%s214_s28 + $0x18] sm:$0xff] %vm416_vm2, %v389_v36 }
 0x133   : > { %v404_v37 = vpop.f32.mrf.mxu3 }
 0x134   : > { %425 = vst.msk [vmem:[%s214_s28 + $0x40] sm:$0xff] %vm416_vm2, %v404_v37 }
 0x137   : > { %v392_v38 = vpop.f32.mrf.mxu1 }
 0x138   : > { %421 = vst.msk [vmem:[%s214_s28 + $0x20] sm:$0xff] %vm416_vm2, %v392_v38 }
 0x13b   : > { %v407_v39 = vpop.f32.mrf.mxu3 }
 0x13c   : > { %426 = vst.msk [vmem:[%s214_s28 + $0x48] sm:$0xff] %vm416_vm2, %v407_v39 }
 0x13f   : > { %v395_v40 = vpop.f32.mrf.mxu1 }
 0x140   : > { %422 = vst.msk [vmem:[%s214_s28 + $0x28] sm:$0xff] %vm416_vm2, %v395_v40 }
 0x143   : > { %v410_v41 = vpop.f32.mrf.mxu3 }
 0x144   : > { %427 = vst.msk [vmem:[%s214_s28 + $0x50] sm:$0xff] %vm416_vm2, %v410_v41 }
 0x147   : > { %v398_v42 = vpop.f32.mrf.mxu1 }
 0x148   : > { %423 = vst.msk [vmem:[%s214_s28 + $0x30] sm:$0xff] %vm416_vm2, %v398_v42 }
 0x14b   : > { %v413_v43 = vpop.f32.mrf.mxu3 }
 0x14c   : > { %428 = vst.msk [vmem:[%s214_s28 + $0x58] sm:$0xff] %vm416_vm2, %v413_v43 }
 0x14d PF: > { %s13_s14 = sadd.s32 1, %s615_s14   ;;  %s756_s12 = smov %s611_s13 }
 0x14e   : > { %p10_p5 = scmp.ge.s32.totalorder %s13_s14, 4   ;;  %s757_s13 = smov %s759_s15 }
 0x150   :  { %12 = sbr.rel (!%p10_p5) target bundleno = 2 (0x2), region = 65 }

</bundles_post_ra>
